<compile_context>
chip_gen: v6e
topology: v6e:2x2x1
jax: 0.10.0
libtpu: 0.0.40
codegen_flags: <defaults>
</compile_context>

<pallas_src>
import functools

import jax
import jax.numpy as jnp
import numpy as np
from jax import lax
from jax.experimental import pallas as pl
from jax.experimental.pallas import tpu as pltpu


def _round_up(v, m):
    return ((v + m - 1) // m) * m


def _pos_emb_kernel(idx_ref, table_ref, w_ref, b_ref, out_ref):
    """One grid step: gather-as-matmul against the fused table, then proj+ReLU.

    idx_ref   : [tile_m, n_cols] int32 indices into the concatenated table
                (offsets for y/w/h sub-tables already applied in the wrapper).
    table_ref : [K, D] f32, K = n_tables * P  (order: x, y, [w], [h]).
    w_ref     : [D, D] f32, transposed nn.Linear weight (so s @ w_ref == s @ W^T).
    b_ref     : [1, D] f32 bias.
    out_ref   : [tile_m, D] f32.
    """
    tm = idx_ref.shape[0]
    K = table_ref.shape[0]
    idx = idx_ref[...]                                        # [tm, n_cols]
    n_cols = idx.shape[1]

    # One iota, shared across all index columns; accumulate a multi-hot matrix
    # (rows may hit the same table row twice -> value 2.0, which is exactly the
    # "same embedding added twice" semantics of the reference).
    iota = lax.broadcasted_iota(jnp.int32, (tm, K), 1)        # [tm, K]
    oh = (idx[:, 0:1] == iota).astype(jnp.float32)
    for c in range(1, n_cols):
        oh = oh + (idx[:, c:c + 1] == iota).astype(jnp.float32)

    # Single fused gather matmul: [tm, K] @ [K, D]  (K = 4P with w+h enabled).
    s = jnp.dot(oh, table_ref[...], preferred_element_type=jnp.float32)

    # pos_input_proj + ReLU.
    proj = jnp.dot(s, w_ref[...], preferred_element_type=jnp.float32) + b_ref[...]
    out_ref[...] = jnp.maximum(proj, 0.0)


def position_embedding_2d(gt_bboxes, params, *, max_pos, use_w, use_h, tile_m=256):
    """gt_bboxes: [B, N, 4] float32 (normalized coords in [0,1]). Returns [B, N, D]."""
    B, N, _ = gt_bboxes.shape
    P = params["x_emb"].shape[0]
    D = params["x_emb"].shape[1]
    assert P == max_pos

    M = B * N
    bboxes_flat = gt_bboxes.reshape(M, 4).astype(jnp.float32)

    # --- Wrapper-side index prep (cheap, removes VPU work from the hot loop) ---
    # clamp(x*P, 0, P-1).long(): values are non-negative after clamp so the
    # int-cast truncation matches torch's .long().
    idx = jnp.clip(bboxes_flat * P, 0.0, float(P - 1)).astype(jnp.int32)  # [M, 4]

    # Concatenated-table column indices (offsets per sub-table).
    cols = [idx[:, 0], idx[:, 2], idx[:, 1] + P, idx[:, 3] + P]  # x1, x2, y1+P, y2+P
    tables = [params["x_emb"], params["y_emb"]]
    off = 2 * P
    if use_w:
        cols.append(idx[:, 2] - idx[:, 0] + off)                 # width index in [0, P-1]
        tables.append(params["w_emb"])
        off += P
    if use_h:
        cols.append(idx[:, 3] - idx[:, 1] + off)                 # height index in [0, P-1]
        tables.append(params["h_emb"])
        off += P
    idx_cat = jnp.stack(cols, axis=1)                            # [M, n_cols] int32
    table_cat = jnp.concatenate(tables, axis=0)                  # [K, D], K = n_tables * P
    K = table_cat.shape[0]
    n_cols = idx_cat.shape[1]

    # --- Row tiling: big MXU-height tiles, but don't over-pad tiny inputs ---
    tile_m = max(8, min(tile_m, _round_up(M, 8)))
    M_pad = _round_up(M, tile_m)
    if M_pad != M:
        idx_cat = jnp.pad(idx_cat, ((0, M_pad - M), (0, 0)))     # padded rows gather row 0; sliced off below

    grid = (M_pad // tile_m,)

    out = pl.pallas_call(
        _pos_emb_kernel,
        out_shape=jax.ShapeDtypeStruct((M_pad, D), jnp.float32),
        grid=grid,
        in_specs=[
            pl.BlockSpec((tile_m, n_cols), lambda i: (i, 0)),    # per-tile indices
            pl.BlockSpec((K, D), lambda i: (0, 0)),              # fused embedding table (resident)
            pl.BlockSpec((D, D), lambda i: (0, 0)),              # proj weight (transposed, resident)
            pl.BlockSpec((1, D), lambda i: (0, 0)),              # proj bias (resident)
        ],
        out_specs=pl.BlockSpec((tile_m, D), lambda i: (i, 0)),
        compiler_params=pltpu.CompilerParams(
            dimension_semantics=("parallel",)),
    )(idx_cat, table_cat, params["proj_w_t"], params["proj_b"])

    return out[:M].reshape(B, N, D)


def _reference(gt_bboxes, params, *, max_pos, use_w, use_h):
    """Pure-JAX reference mirroring the PyTorch forward."""
    idx = jnp.clip(gt_bboxes * max_pos, 0, max_pos - 1).astype(jnp.int32)
    s = (params["x_emb"][idx[..., 0]] + params["y_emb"][idx[..., 1]]
         + params["x_emb"][idx[..., 2]] + params["y_emb"][idx[..., 3]])
    if use_w:
        s = s + params["w_emb"][idx[..., 2] - idx[..., 0]]
    if use_h:
        s = s + params["h_emb"][idx[..., 3] - idx[..., 1]]
    return jax.nn.relu(s @ params["proj_w_t"] + params["proj_b"][0])


if __name__ == "__main__":
    # Small but hardware-friendly shapes.
    B, N = 2, 8           # 2 images, 8 boxes each
    P = 128               # max_position_embeddings
    D = 128               # embedding_dim
    USE_W, USE_H = True, True

    key = jax.random.PRNGKey(0)
    k_box, k_x, k_y, k_w, k_h, k_pw, k_pb = jax.random.split(key, 7)

    # Deterministic synthetic "weights" (no checkpoint load).
    params = {
        "x_emb": jax.random.normal(k_x, (P, D), jnp.float32) * 0.02,
        "y_emb": jax.random.normal(k_y, (P, D), jnp.float32) * 0.02,
        "w_emb": jax.random.normal(k_w, (P, D), jnp.float32) * 0.02,
        "h_emb": jax.random.normal(k_h, (P, D), jnp.float32) * 0.02,
        # nn.Linear weight is [out, in]; store its transpose [in, out] for x @ W^T.
        "proj_w_t": (jax.random.normal(k_pw, (D, D), jnp.float32) * 0.05).T,
        "proj_b": jax.random.normal(k_pb, (1, D), jnp.float32) * 0.01,
    }

    # Normalized bboxes in [0, 1] with x1<=x2, y1<=y2.
    raw = jax.random.uniform(k_box, (B, N, 4), jnp.float32)
    x1 = jnp.minimum(raw[..., 0], raw[..., 2])
    x2 = jnp.maximum(raw[..., 0], raw[..., 2])
    y1 = jnp.minimum(raw[..., 1], raw[..., 3])
    y2 = jnp.maximum(raw[..., 1], raw[..., 3])
    gt_bboxes = jnp.stack([x1, y1, x2, y2], axis=-1)

    out = position_embedding_2d(gt_bboxes, params, max_pos=P,
                                use_w=USE_W, use_h=USE_H, tile_m=256)
    out = jax.block_until_ready(out)

    ref = _reference(gt_bboxes, params, max_pos=P, use_w=USE_W, use_h=USE_H)
    np.testing.assert_allclose(np.asarray(out), np.asarray(ref),
                               rtol=1e-5, atol=1e-5)
    assert out.shape == (B, N, D)
    print("KERNEL_OK")
</pallas_src>

<mosaic_0001>
module attributes {stable_mosaic.version = 11 : i64} {
  func.func @_pos_emb_kernel(%arg0: i32, %arg1: memref<16x6xi32, #tpu.memory_space<vmem>>, %arg2: memref<512x128xf32, #tpu.memory_space<vmem>>, %arg3: memref<128x128xf32, #tpu.memory_space<vmem>>, %arg4: memref<1x128xf32, #tpu.memory_space<vmem>>, %arg5: memref<16x128xf32, #tpu.memory_space<vmem>>) attributes {dimension_semantics = [#tpu.dimension_semantics<parallel>], iteration_bounds = array<i64: 1>, scalar_prefetch = 0 : i64, scratch_operands = 0 : i64, tpu.core_type = #tpu.core_type<tc>, window_params = [{transform_indices = @transform_0, window_bounds = array<i64: 16, 6>}, {pipeline_mode = #tpu.pipeline_mode<synchronous>, transform_indices = @transform_1, window_bounds = array<i64: 512, 128>}, {pipeline_mode = #tpu.pipeline_mode<synchronous>, transform_indices = @transform_2, window_bounds = array<i64: 128, 128>}, {pipeline_mode = #tpu.pipeline_mode<synchronous>, transform_indices = @transform_3, window_bounds = array<i64: 1, 128>}, {transform_indices = @transform_4, window_bounds = array<i64: 16, 128>}]} {
    %c0 = arith.constant 0 : index
    %c0_0 = arith.constant 0 : index
    %0 = vector.load %arg1[%c0, %c0_0] : memref<16x6xi32, #tpu.memory_space<vmem>>, vector<16x6xi32>
    %1 = tpu.iota {dimensions = array<i32: 1>} : vector<16x512xi32>
    %2 = vector.extract_strided_slice %0 {offsets = [0, 0], sizes = [16, 1], strides = [1, 1]} : vector<16x6xi32> to vector<16x1xi32>
    %3 = vector.broadcast %2 : vector<16x1xi32> to vector<16x512xi32>
    %4 = arith.cmpi eq, %3, %1 : vector<16x512xi32>
    %5 = arith.extui %4 : vector<16x512xi1> to vector<16x512xi32>
    %6 = arith.sitofp %5 : vector<16x512xi32> to vector<16x512xf32>
    %7 = vector.extract_strided_slice %0 {offsets = [0, 1], sizes = [16, 1], strides = [1, 1]} : vector<16x6xi32> to vector<16x1xi32>
    %8 = vector.broadcast %7 : vector<16x1xi32> to vector<16x512xi32>
    %9 = arith.cmpi eq, %8, %1 : vector<16x512xi32>
    %10 = arith.extui %9 : vector<16x512xi1> to vector<16x512xi32>
    %11 = arith.sitofp %10 : vector<16x512xi32> to vector<16x512xf32>
    %12 = arith.addf %6, %11 : vector<16x512xf32>
    %13 = vector.extract_strided_slice %0 {offsets = [0, 2], sizes = [16, 1], strides = [1, 1]} : vector<16x6xi32> to vector<16x1xi32>
    %14 = vector.broadcast %13 : vector<16x1xi32> to vector<16x512xi32>
    %15 = arith.cmpi eq, %14, %1 : vector<16x512xi32>
    %16 = arith.extui %15 : vector<16x512xi1> to vector<16x512xi32>
    %17 = arith.sitofp %16 : vector<16x512xi32> to vector<16x512xf32>
    %18 = arith.addf %12, %17 : vector<16x512xf32>
    %19 = vector.extract_strided_slice %0 {offsets = [0, 3], sizes = [16, 1], strides = [1, 1]} : vector<16x6xi32> to vector<16x1xi32>
    %20 = vector.broadcast %19 : vector<16x1xi32> to vector<16x512xi32>
    %21 = arith.cmpi eq, %20, %1 : vector<16x512xi32>
    %22 = arith.extui %21 : vector<16x512xi1> to vector<16x512xi32>
    %23 = arith.sitofp %22 : vector<16x512xi32> to vector<16x512xf32>
    %24 = arith.addf %18, %23 : vector<16x512xf32>
    %25 = vector.extract_strided_slice %0 {offsets = [0, 4], sizes = [16, 1], strides = [1, 1]} : vector<16x6xi32> to vector<16x1xi32>
    %26 = vector.broadcast %25 : vector<16x1xi32> to vector<16x512xi32>
    %27 = arith.cmpi eq, %26, %1 : vector<16x512xi32>
    %28 = arith.extui %27 : vector<16x512xi1> to vector<16x512xi32>
    %29 = arith.sitofp %28 : vector<16x512xi32> to vector<16x512xf32>
    %30 = arith.addf %24, %29 : vector<16x512xf32>
    %31 = vector.extract_strided_slice %0 {offsets = [0, 5], sizes = [16, 1], strides = [1, 1]} : vector<16x6xi32> to vector<16x1xi32>
    %32 = vector.broadcast %31 : vector<16x1xi32> to vector<16x512xi32>
    %33 = arith.cmpi eq, %32, %1 : vector<16x512xi32>
    %34 = arith.extui %33 : vector<16x512xi1> to vector<16x512xi32>
    %35 = arith.sitofp %34 : vector<16x512xi32> to vector<16x512xf32>
    %36 = arith.addf %30, %35 : vector<16x512xf32>
    %c0_1 = arith.constant 0 : index
    %c0_2 = arith.constant 0 : index
    %37 = vector.load %arg2[%c0_1, %c0_2] : memref<512x128xf32, #tpu.memory_space<vmem>>, vector<512x128xf32>
    %cst = arith.constant dense<0.000000e+00> : vector<16x128xf32>
    %38 = tpu.matmul %36, %37, %cst {dimension_numbers = #tpu.dot_dimension_numbers<[1], [0], [0], [1], [0, 0, 1, 1], [], []>} : vector<16x512xf32>, vector<512x128xf32>, vector<16x128xf32> -> vector<16x128xf32>
    %c0_3 = arith.constant 0 : index
    %c0_4 = arith.constant 0 : index
    %39 = vector.load %arg3[%c0_3, %c0_4] : memref<128x128xf32, #tpu.memory_space<vmem>>, vector<128x128xf32>
    %cst_5 = arith.constant dense<0.000000e+00> : vector<16x128xf32>
    %40 = tpu.matmul %38, %39, %cst_5 {dimension_numbers = #tpu.dot_dimension_numbers<[1], [0], [0], [1], [0, 0, 1, 1], [], []>} : vector<16x128xf32>, vector<128x128xf32>, vector<16x128xf32> -> vector<16x128xf32>
    %c0_6 = arith.constant 0 : index
    %c0_7 = arith.constant 0 : index
    %41 = vector.load %arg4[%c0_6, %c0_7] : memref<1x128xf32, #tpu.memory_space<vmem>>, vector<1x128xf32>
    %42 = vector.broadcast %41 : vector<1x128xf32> to vector<16x128xf32>
    %43 = arith.addf %40, %42 : vector<16x128xf32>
    %cst_8 = arith.constant 0.000000e+00 : f32
    %44 = vector.broadcast %cst_8 : f32 to vector<16x128xf32>
    %45 = arith.maximumf %43, %44 : vector<16x128xf32>
    %c0_9 = arith.constant 0 : index
    %c0_10 = arith.constant 0 : index
    %46 = vector.load %arg5[%c0_9, %c0_10] : memref<16x128xf32, #tpu.memory_space<vmem>>, vector<16x128xf32>
    tpu.vector_store %arg5[%c0_9, %c0_10], %45 {strides = array<i32>} : memref<16x128xf32, #tpu.memory_space<vmem>>, vector<16x128xf32>,
    return
  }
  func.func @transform_0(%arg0: i32) -> (i32, i32) {
    %c0_i32 = arith.constant 0 : i32
    %c0_i32_0 = arith.constant 0 : i32
    return %arg0, %c0_i32 : i32, i32
  }
  func.func @transform_1(%arg0: i32) -> (i32, i32) {
    %c0_i32 = arith.constant 0 : i32
    %c0_i32_0 = arith.constant 0 : i32
    %c0_i32_1 = arith.constant 0 : i32
    return %c0_i32, %c0_i32_0 : i32, i32
  }
  func.func @transform_2(%arg0: i32) -> (i32, i32) {
    %c0_i32 = arith.constant 0 : i32
    %c0_i32_0 = arith.constant 0 : i32
    %c0_i32_1 = arith.constant 0 : i32
    return %c0_i32, %c0_i32_0 : i32, i32
  }
  func.func @transform_3(%arg0: i32) -> (i32, i32) {
    %c0_i32 = arith.constant 0 : i32
    %c0_i32_0 = arith.constant 0 : i32
    %c0_i32_1 = arith.constant 0 : i32
    return %c0_i32, %c0_i32_0 : i32, i32
  }
  func.func @transform_4(%arg0: i32) -> (i32, i32) {
    %c0_i32 = arith.constant 0 : i32
    %c0_i32_0 = arith.constant 0 : i32
    return %arg0, %c0_i32 : i32, i32
  }
}

</mosaic_0001>

<bundles_post_ra>
// kernel: tpu_custom_call.1
= control target key start
LH: loop header
LB: loop body
LE: loop exit
PB: predicated region body
PF: predicated region fallthrough
CT: control target
= control target key end

     0   :  { %9 = vsyncpa [#allocation3], 0  ;;  %s1103_s0 = inlined_call_operand.vmem [shape: s32[16,6], index: 0, kind: input, shape index: {}]   ;;  %s1104_s1 = inlined_call_operand.hbm [shape: f32[512,128], index: 1, kind: input, shape index: {}]   ;;  %s1105_s2 = inlined_call_operand.hbm [shape: f32[128,128], index: 2, kind: input, shape index: {}]   ;;  %s1106_s3 = inlined_call_operand.vmem [shape: f32[1,128], index: 3, kind: input, shape index: {}]   ;;  %s1107_s4 = inlined_call_operand.hbm [shape: f32[16,128], index: 4, kind: output, shape index: {}]  }
   0x1   :  { %10 = vsyncpa [#allocation6], 0 }
   0x2   :  { %11 = vsyncpa [#allocation4], 0  ;;  %s874_s15 = smov [#allocation2]  }
   0x3   :  { %s19_s16 = sshll.u32 %s874_s15, 4  ;;  %s20_s16 = int_to_ptr.vmem [resolvable:$true] %s19_s16 }
   0x4   :  { %s816_s17 = scalar_lea.vmem %s20_s16, 8192  ;;  %p821_p1 = scmp.lt.s32.totalorder %s20_s16, %s20_s16 }
   0x5   :  { %p817_p0 = scmp.ne.s32.totalorder %s20_s16, %s816_s17  ;;  %p822_p2 = scmp.lt.s32.totalorder %s816_s17, %s816_s17 }
   0x7   :  { %p823_p3 = por %p822_p2, %p821_p1 }
   0x9   :  { %p824_p4 = pnand %p823_p3, %p817_p0 }
   0xb   :  { %827 = shalt.err (!%p824_p4)
}
   0xc   :  { %s875_s18 = smov 128   ;;  %s876_s19 = smov 8  }
   0xd   :  { %25 = dma.hbm_to_vmem [thread:$0]  %s1104_s1, 8192, %s20_s16, [#allocation3], %s875_s18, %s875_s18, %s876_s19  }
   0xe   :  { %s877_s22 = smov [#allocation5]  }
   0xf   :  { %s31_s23 = sshll.u32 %s877_s22, 4  ;;  %s32_s23 = int_to_ptr.vmem [resolvable:$true] %s31_s23 }
  0x10   :  { %s836_s24 = scalar_lea.vmem %s32_s23, 2048  ;;  %p841_p6 = scmp.lt.s32.totalorder %s32_s23, %s32_s23 }
  0x11   :  { %p837_p5 = scmp.ne.s32.totalorder %s32_s23, %s836_s24  ;;  %p842_p7 = scmp.lt.s32.totalorder %s836_s24, %s836_s24 }
  0x13   :  { %p843_p8 = por %p842_p7, %p841_p6 }
  0x15   :  { %p844_p9 = pnand %p843_p8, %p837_p5 }
  0x17   :  { %847 = shalt.err (!%p844_p9)
}
  0x18   :  { %37 = dma.hbm_to_vmem [thread:$0]  %s1105_s2, 2048, %s32_s23, [#allocation6], %s875_s18, %s875_s18, %s876_s19  }
  0x19   :  { %868 = dma.done.wait [#allocation3], 8192  }
  0x1a   :  { %869 = vsyncadd [#allocation3], 4294959104 }
  0x1b   :  { %870 = dma.done.wait [#allocation6], 2048  }
  0x1c   :  { %871 = vsyncadd [#allocation6], 4294965248  ;;  %v878_v0 = vmov 2   ;;  %v879_v1 = vmov 0   ;;  %v926_v2 = vld [vmem:[%s1103_s0] sm:$0xff]  ;;  %v304_v3 = vld [vmem:[#allocation2 + $0xf8] sm:$0xff] }
  0x1d   :  { %799 = vset.pattern.permute.xlu1 %v878_v0  ;;  %797 = vset.pattern.permute.xlu0 %v879_v1  ;;  %v336_v4 = vld [vmem:[#allocation2 + $0x1f8] sm:$0xff]  ;;  %v303_v7 = vld [vmem:[#allocation2 + $0xf0] sm:$0xff]  ;;  %v933_v9 = vld [vmem:[%s1103_s0 + $0x8] sm:$0xff]  ;;  %v880_v12 = vmov 1   ;;  %v881_v19 = vmov 3   ;;  %v882_v31 = vmov 4  }
  0x1e   :  { %122 = vperm.xlu1 %799, %v926_v2   ;;  %54 = vperm.xlu0 %797, %v926_v2   ;;  %v288_v5 = vld [vmem:[#allocation2 + $0x78] sm:$0xff]  ;;  %v335_v8 = vld [vmem:[#allocation2 + $0x1f0] sm:$0xff]  ;;  %v302_v13 = vld [vmem:[#allocation2 + $0xe8] sm:$0xff]  ;;  %v883_v42 = vmov 5   ;;  %s885_s30 = smov [#allocation7]  }
  0x1f   :  { %v320_v6 = vld [vmem:[#allocation2 + $0x178] sm:$0xff]  ;;  %656 = vmatprep.subr.mxu0 %v304_v3  ;;  %694 = vmatprep.subr.mxu1 %v336_v4  ;;  %v287_v10 = vld [vmem:[#allocation2 + $0x70] sm:$0xff]  ;;  %v334_v14 = vld [vmem:[#allocation2 + $0x1e8] sm:$0xff]  ;;  %s594_s5 = sshll.u32 %s885_s30, 4  ;;  %s595_s5 = int_to_ptr.vmem [resolvable:$true] %s594_s5 }
  0x20   :  { %657 = vmatpush3.msra.mxu0 %v288_v5  ;;  %695 = vmatpush3.msra.mxu1 %v320_v6  ;;  %v319_v11 = vld [vmem:[#allocation2 + $0x170] sm:$0xff]  ;;  %v286_v15 = vld [vmem:[#allocation2 + $0x68] sm:$0xff]  ;;  %v301_v17 = vld [vmem:[#allocation2 + $0xe0] sm:$0xff]  ;;  %s848_s6 = scalar_lea.vmem %s595_s5, 256  ;;  %p853_p11 = scmp.lt.s32.totalorder %s595_s5, %s595_s5 }
  0x21   :  { %658 = vmatprep.subr.mxu0 %v303_v7  ;;  %696 = vmatprep.subr.mxu1 %v335_v8  ;;  %v318_v16 = vld [vmem:[#allocation2 + $0x168] sm:$0xff]  ;;  %v333_v18 = vld [vmem:[#allocation2 + $0x1e0] sm:$0xff]  ;;  %v300_v22 = vld [vmem:[#allocation2 + $0xd8] sm:$0xff]  ;;  %p849_p10 = scmp.ne.s32.totalorder %s595_s5, %s848_s6  ;;  %p854_p12 = scmp.lt.s32.totalorder %s848_s6, %s848_s6 }
  0x22   :  { %800 = vset.pattern.permute.xlu1 %v879_v1  ;;  %798 = vset.pattern.permute.xlu0 %v880_v12  ;;  %v285_v20 = vld [vmem:[#allocation2 + $0x60] sm:$0xff]  ;;  %v332_v23 = vld [vmem:[#allocation2 + $0x1d8] sm:$0xff]  ;;  %v299_v26 = vld [vmem:[#allocation2 + $0xd0] sm:$0xff] }
  0x23   :  { %57 = vperm.xlu1 %800, %v933_v9   ;;  %84 = vperm.xlu0 %798, %v926_v2   ;;  %v317_v21 = vld [vmem:[#allocation2 + $0x160] sm:$0xff]  ;;  %v284_v24 = vld [vmem:[#allocation2 + $0x58] sm:$0xff]  ;;  %v331_v27 = vld [vmem:[#allocation2 + $0x1d0] sm:$0xff]  ;;  %p855_p13 = por %p854_p12, %p853_p11 }
  0x24   :  { %659 = vmatpush3.msra.mxu0 %v287_v10  ;;  %697 = vmatpush3.msra.mxu1 %v319_v11  ;;  %v316_v25 = vld [vmem:[#allocation2 + $0x158] sm:$0xff]  ;;  %v283_v28 = vld [vmem:[#allocation2 + $0x50] sm:$0xff]  ;;  %v298_v30 = vld [vmem:[#allocation2 + $0xc8] sm:$0xff] }
  0x25   :  { %660 = vmatprep.subr.mxu0 %v302_v13  ;;  %698 = vmatprep.subr.mxu1 %v334_v14  ;;  %v315_v29 = vld [vmem:[#allocation2 + $0x150] sm:$0xff]  ;;  %v330_v32 = vld [vmem:[#allocation2 + $0x1c8] sm:$0xff]  ;;  %v297_v35 = vld [vmem:[#allocation2 + $0xc0] sm:$0xff]  ;;  %p856_p0 = pnand %p855_p13, %p849_p10 }
  0x26   :  { %661 = vmatpush3.msra.mxu0 %v286_v15  ;;  %699 = vmatpush3.msra.mxu1 %v318_v16  ;;  %v282_v33 = vld [vmem:[#allocation2 + $0x48] sm:$0xff]  ;;  %v329_v36 = vld [vmem:[#allocation2 + $0x1c0] sm:$0xff]  ;;  %v296_v39 = vld [vmem:[#allocation2 + $0xb8] sm:$0xff]  ;;  %v884_v16 = vmov 0.0  }
  0x27   :  { %801 = vset.pattern.permute.xlu1 %v880_v12  ;;  %802 = vset.pattern.permute.xlu0 %v881_v19  ;;  %v314_v34 = vld [vmem:[#allocation2 + $0x148] sm:$0xff]  ;;  %v281_v37 = vld [vmem:[#allocation2 + $0x40] sm:$0xff]  ;;  %v328_v40 = vld [vmem:[#allocation2 + $0x1b8] sm:$0xff] }
  0x28   :  { %87 = vperm.xlu1 %801, %v933_v9   ;;  %160 = vperm.xlu0 %802, %v926_v2   ;;  %v313_v38 = vld [vmem:[#allocation2 + $0x140] sm:$0xff]  ;;  %v280_v41 = vld [vmem:[#allocation2 + $0x38] sm:$0xff]  ;;  %v295_v44 = vld [vmem:[#allocation2 + $0xb0] sm:$0xff] }
  0x29   :  { %662 = vmatprep.subr.mxu0 %v301_v17  ;;  %700 = vmatprep.subr.mxu1 %v333_v18  ;;  %v312_v43 = vld [vmem:[#allocation2 + $0x138] sm:$0xff]  ;;  %v327_v45 = vld [vmem:[#allocation2 + $0x1b0] sm:$0xff]  ;;  %v294_v48 = vld [vmem:[#allocation2 + $0xa8] sm:$0xff] }
  0x2a   :  { %663 = vmatpush3.msra.mxu0 %v285_v20  ;;  %701 = vmatpush3.msra.mxu1 %v317_v21  ;;  %v279_v46 = vld [vmem:[#allocation2 + $0x30] sm:$0xff]  ;;  %v326_v49 = vld [vmem:[#allocation2 + $0x1a8] sm:$0xff]  ;;  %v293_v52 = vld [vmem:[#allocation2 + $0xa0] sm:$0xff] }
  0x2b   :  { %664 = vmatprep.subr.mxu0 %v300_v22  ;;  %702 = vmatprep.subr.mxu1 %v332_v23  ;;  %v311_v47 = vld [vmem:[#allocation2 + $0x130] sm:$0xff]  ;;  %v278_v50 = vld [vmem:[#allocation2 + $0x28] sm:$0xff]  ;;  %v325_v53 = vld [vmem:[#allocation2 + $0x1a0] sm:$0xff] }
  0x2c   :  { %803 = vset.pattern.permute.xlu1 %v878_v0  ;;  %163 = vperm.xlu0 %802, %v933_v9   ;;  %v310_v51 = vld [vmem:[#allocation2 + $0x128] sm:$0xff]  ;;  %v277_v54 = vld [vmem:[#allocation2 + $0x20] sm:$0xff]  ;;  %v292_v56 = vld [vmem:[#allocation2 + $0x98] sm:$0xff] }
  0x2d   :  { %125 = vperm.xlu1 %803, %v933_v9   ;;  %665 = vmatpush3.msra.mxu0 %v284_v24  ;;  %v309_v55 = vld [vmem:[#allocation2 + $0x120] sm:$0xff]  ;;  %v324_v57 = vld [vmem:[#allocation2 + $0x198] sm:$0xff]  ;;  %v291_v60 = vld [vmem:[#allocation2 + $0x90] sm:$0xff] }
  0x2e   :  { %703 = vmatpush3.msra.mxu1 %v316_v25  ;;  %666 = vmatprep.subr.mxu0 %v299_v26  ;;  %v276_v58 = vld [vmem:[#allocation2 + $0x18] sm:$0xff]  ;;  %v323_v61 = vld [vmem:[#allocation2 + $0x190] sm:$0xff]  ;;  %v290_v0 = vld [vmem:[#allocation2 + $0x88] sm:$0xff] }
  0x2f   :  { %704 = vmatprep.subr.mxu1 %v331_v27  ;;  %667 = vmatpush3.msra.mxu0 %v283_v28  ;;  %v308_v59 = vld [vmem:[#allocation2 + $0x118] sm:$0xff]  ;;  %v275_v62 = vld [vmem:[#allocation2 + $0x10] sm:$0xff]  ;;  %v322_v1 = vld [vmem:[#allocation2 + $0x188] sm:$0xff] }
  0x30   :  { %806 = vset.pattern.permute.xlu0 %v882_v31  ;;  %705 = vmatpush3.msra.mxu1 %v315_v29  ;;  %v307_v63 = vld [vmem:[#allocation2 + $0x110] sm:$0xff]  ;;  %v306_v3 = vld [vmem:[#allocation2 + $0x108] sm:$0xff]  ;;  %v289_v4 = vld [vmem:[#allocation2 + $0x80] sm:$0xff] }
  0x31   :  { %804 = vset.pattern.permute.xlu1 %v882_v31  ;;  %201 = vperm.xlu0 %806, %v933_v9   ;;  %v321_v5 = vld [vmem:[#allocation2 + $0x180] sm:$0xff]  ;;  %v946_v8 = vld [vmem:[#allocation5 + $0x78] sm:$0xff] }
  0x32   :  { %198 = vperm.xlu1 %804, %v926_v2   ;;  %668 = vmatprep.subr.mxu0 %v298_v30  ;;  %v273_v6 = vld [vmem:[#allocation2] sm:$0xff] }
  0x33   :  { %706 = vmatprep.subr.mxu1 %v330_v32  ;;  %669 = vmatpush3.msra.mxu0 %v282_v33  ;;  %v305_v7 = vld [vmem:[#allocation2 + $0x100] sm:$0xff] }
  0x34   :  { %707 = vmatpush3.msra.mxu1 %v314_v34  ;;  %670 = vmatprep.subr.mxu0 %v297_v35 }
  0x35   :  { %708 = vmatprep.subr.mxu1 %v329_v36  ;;  %671 = vmatpush3.msra.mxu0 %v281_v37 }
  0x36   :  { %805 = vset.pattern.permute.xlu1 %v883_v42  ;;  %709 = vmatpush3.msra.mxu1 %v313_v38 }
  0x37   :  { %236 = vperm.xlu1 %805, %v926_v2   ;;  %672 = vmatprep.subr.mxu0 %v296_v39  ;;  %v274_v2 = vld [vmem:[#allocation2 + $0x8] sm:$0xff] }
  0x38   :  { %710 = vmatprep.subr.mxu1 %v328_v40  ;;  %673 = vmatpush3.msra.mxu0 %v280_v41 }
  0x39   :  { %711 = vmatpush3.msra.mxu1 %v312_v43  ;;  %674 = vmatprep.subr.mxu0 %v295_v44 }
  0x3a   :  { %712 = vmatprep.subr.mxu1 %v327_v45  ;;  %675 = vmatpush3.msra.mxu0 %v279_v46 }
  0x3b   :  { %239 = vperm.xlu1 %805, %v933_v9   ;;  %713 = vmatpush3.msra.mxu1 %v311_v47  ;;  %v48_v9 = vlaneseq }
  0x3c   :  { %676 = vmatprep.subr.mxu0 %v294_v48  ;;  %714 = vmatprep.subr.mxu1 %v326_v49 }
  0x3d   :  { %677 = vmatpush3.msra.mxu0 %v278_v50  ;;  %715 = vmatpush3.msra.mxu1 %v310_v51  ;;  %v950_v10 = vand.u32 127, %v48_v9 }
  0x3e   :  { %678 = vmatprep.subr.mxu0 %v293_v52  ;;  %716 = vmatprep.subr.mxu1 %v325_v53 }
  0x3f   :  { %679 = vmatpush3.msra.mxu0 %v277_v54  ;;  %717 = vmatpush3.msra.mxu1 %v309_v55  ;;  %v953_v11 = vadd.s32 128, %v950_v10  ;;  %v956_v12 = vadd.s32 256, %v950_v10  ;;  %v959_v13 = vadd.s32 384, %v950_v10 }
  0x40   :  { %680 = vmatprep.subr.mxu0 %v292_v56  ;;  %718 = vmatprep.subr.mxu1 %v324_v57 }
  0x41   :  { %681 = vmatpush3.msra.mxu0 %v276_v58  ;;  %719 = vmatpush3.msra.mxu1 %v308_v59 }
  0x42   :  { %682 = vmatprep.subr.mxu0 %v291_v60  ;;  %720 = vmatprep.subr.mxu1 %v323_v61 }
  0x43   :  { %683 = vmatpush3.msra.mxu0 %v275_v62  ;;  %721 = vmatpush3.msra.mxu1 %v307_v63 }
  0x44   :  { %684 = vmatprep.subr.mxu0 %v290_v0  ;;  %722 = vmatprep.subr.mxu1 %v322_v1 }
  0x45   :  { %685 = vmatpush3.msra.mxu0 %v274_v2  ;;  %723 = vmatpush3.msra.mxu1 %v306_v3 }
  0x46   :  { %686 = vmatprep.subr.mxu0 %v289_v4  ;;  %724 = vmatprep.subr.mxu1 %v321_v5 }
  0x47   :  { %687 = vmatpush3.msra.mxu0 %v273_v6  ;;  %725 = vmatpush3.msra.mxu1 %v305_v7 }
  0x48   :  { %750 = vmatprep.subr.mxu0 %v946_v8  ;;  %807 = vset.pattern.permute.xlu0 %v883_v42 }
  0x99   :  { %v123_v14 = vpop.permute.xlu1 %122  ;;  %v55_v15 = vpop.permute.xlu0 %54 }
  0x9a   :  { %vm127_vm0 = vcmp.eq.s32.totalorder %v123_v14, %v950_v10  ;;  %vm128_vm1 = vcmp.eq.s32.totalorder %v123_v14, %v953_v11  ;;  %vm129_vm2 = vcmp.eq.s32.totalorder %v123_v14, %v956_v12  ;;  %vm130_vm3 = vcmp.eq.s32.totalorder %v123_v14, %v959_v13 }
  0x9b   :  { %vm59_vm4 = vcmp.eq.s32.totalorder %v55_v15, %v950_v10  ;;  %vm60_vm5 = vcmp.eq.s32.totalorder %v55_v15, %v953_v11  ;;  %vm61_vm6 = vcmp.eq.s32.totalorder %v55_v15, %v956_v12  ;;  %vm62_vm7 = vcmp.eq.s32.totalorder %v55_v15, %v959_v13 }
  0x9c   :  { %v623_v17 = vsel %vm127_vm0, 1.0, %v884_v16  ;;  %v971_v18 = vsel %vm128_vm1, 1.0, %v884_v16  ;;  %v625_v19 = vsel %vm129_vm2, 1.0, %v884_v16  ;;  %v975_v22 = vsel %vm130_vm3, 1.0, %v884_v16 }
  0x9d   :  { %v607_v23 = vsel %vm59_vm4, 1.0, %v884_v16  ;;  %v608_v24 = vsel %vm60_vm5, 1.0, %v884_v16  ;;  %v609_v25 = vsel %vm61_vm6, 1.0, %v884_v16  ;;  %v610_v26 = vsel %vm62_vm7, 1.0, %v884_v16 }
  0x9e   :  { %v58_v20 = vpop.permute.xlu1 %57  ;;  %v85_v21 = vpop.permute.xlu0 %84 }
  0x9f   :  { %vm63_vm8 = vcmp.eq.s32.totalorder %v58_v20, %v950_v10  ;;  %vm64_vm9 = vcmp.eq.s32.totalorder %v58_v20, %v953_v11  ;;  %vm65_vm10 = vcmp.eq.s32.totalorder %v58_v20, %v956_v12  ;;  %vm89_vm11 = vcmp.eq.s32.totalorder %v85_v21, %v950_v10 }
  0xa0   :  { %vm90_vm12 = vcmp.eq.s32.totalorder %v85_v21, %v953_v11  ;;  %vm91_vm13 = vcmp.eq.s32.totalorder %v85_v21, %v956_v12  ;;  %vm92_vm14 = vcmp.eq.s32.totalorder %v85_v21, %v959_v13  ;;  %vm66_vm15 = vcmp.eq.s32.totalorder %v58_v20, %v959_v13 }
  0xa1   :  { %v611_v27 = vsel %vm63_vm8, 1.0, %v884_v16  ;;  %v615_v28 = vsel %vm89_vm11, 1.0, %v884_v16  ;;  %v617_v29 = vsel %vm91_vm13, 1.0, %v884_v16  ;;  %v616_v30 = vsel %vm90_vm12, 1.0, %v884_v16 }
  0xa2   :  { %v618_v31 = vsel %vm92_vm14, 1.0, %v884_v16  ;;  %v113_v32 = vadd.f32 %v615_v28, %v607_v23  ;;  %v115_v33 = vadd.f32 %v617_v29, %v609_v25  ;;  %v612_v40 = vsel %vm64_vm9, 1.0, %v884_v16 }
  0xa3   :  { %v88_v34 = vpop.permute.xlu1 %87  ;;  %v994_v35 = vpop.permute.xlu0 %160  ;;  %v613_v41 = vsel %vm65_vm10, 1.0, %v884_v16  ;;  %v614_v42 = vsel %vm66_vm15, 1.0, %v884_v16  ;;  %v114_v43 = vadd.f32 %v616_v30, %v608_v24  ;;  %v1013_v44 = vadd.f32 %v618_v31, %v610_v26 }
  0xa4   :  { %vm93_vm0 = vcmp.eq.s32.totalorder %v88_v34, %v950_v10  ;;  %vm94_vm1 = vcmp.eq.s32.totalorder %v88_v34, %v953_v11  ;;  %vm95_vm2 = vcmp.eq.s32.totalorder %v88_v34, %v956_v12  ;;  %vm96_vm3 = vcmp.eq.s32.totalorder %v88_v34, %v959_v13 }
  0xa5   :  { %v619_v36 = vsel %vm93_vm0, 1.0, %v884_v16  ;;  %v620_v37 = vsel %vm94_vm1, 1.0, %v884_v16  ;;  %v621_v38 = vsel %vm95_vm2, 1.0, %v884_v16  ;;  %v622_v39 = vsel %vm96_vm3, 1.0, %v884_v16 }
  0xa6   :  { %v117_v45 = vadd.f32 %v619_v36, %v611_v27  ;;  %v118_v46 = vadd.f32 %v620_v37, %v612_v40  ;;  %vm165_vm4 = vcmp.eq.s32.totalorder %v994_v35, %v950_v10  ;;  %v119_v48 = vadd.f32 %v621_v38, %v613_v41 }
  0xa7   :  { %v164_v47 = vpop.permute.xlu0 %163  ;;  %v120_v49 = vadd.f32 %v622_v39, %v614_v42  ;;  %v151_v50 = vadd.f32 %v623_v17, %v113_v32  ;;  %v153_v51 = vadd.f32 %v625_v19, %v115_v33  ;;  %vm166_vm5 = vcmp.eq.s32.totalorder %v994_v35, %v953_v11 }
  0xa8   :  { %v126_v52 = vpop.permute.xlu1 %125  ;;  %vm167_vm6 = vcmp.eq.s32.totalorder %v994_v35, %v956_v12  ;;  %v631_v53 = vsel %vm165_vm4, 1.0, %v884_v16  ;;  %vm168_vm11 = vcmp.eq.s32.totalorder %v994_v35, %v959_v13  ;;  %vm169_vm12 = vcmp.eq.s32.totalorder %v164_v47, %v950_v10 }
  0xa9   :  { %vm131_vm7 = vcmp.eq.s32.totalorder %v126_v52, %v950_v10  ;;  %vm132_vm8 = vcmp.eq.s32.totalorder %v126_v52, %v953_v11  ;;  %vm133_vm9 = vcmp.eq.s32.totalorder %v126_v52, %v956_v12  ;;  %vm134_vm10 = vcmp.eq.s32.totalorder %v126_v52, %v959_v13 }
  0xaa   :  { %v627_v54 = vsel %vm131_vm7, 1.0, %v884_v16  ;;  %v628_v55 = vsel %vm132_vm8, 1.0, %v884_v16  ;;  %v629_v56 = vsel %vm133_vm9, 1.0, %v884_v16  ;;  %v630_v57 = vsel %vm134_vm10, 1.0, %v884_v16 }
  0xab   :  { %v155_v58 = vadd.f32 %v627_v54, %v117_v45  ;;  %v156_v59 = vadd.f32 %v628_v55, %v118_v46  ;;  %v158_v60 = vadd.f32 %v630_v57, %v120_v49  ;;  %vm170_vm13 = vcmp.eq.s32.totalorder %v164_v47, %v953_v11  ;;  %v500_v55 = vld [vmem:[#allocation5 + $0x68] sm:$0xff] }
  0xac   :  { %v202_v61 = vpop.permute.xlu0 %201  ;;  %v157_v62 = vadd.f32 %v629_v56, %v119_v48  ;;  %vm171_vm14 = vcmp.eq.s32.totalorder %v164_v47, %v956_v12  ;;  %vm172_vm15 = vcmp.eq.s32.totalorder %v164_v47, %v959_v13  ;;  %v636_v63 = vsel %vm170_vm13, 1.0, %v884_v16  ;;  %v497_v56 = vld [vmem:[#allocation5 + $0x50] sm:$0xff]  ;;  %v496_v57 = vld [vmem:[#allocation5 + $0x48] sm:$0xff] }
  0xad   :  { %v199_v0 = vpop.permute.xlu1 %198  ;;  %v633_v1 = vsel %vm167_vm6, 1.0, %v884_v16  ;;  %v635_v2 = vsel %vm169_vm12, 1.0, %v884_v16  ;;  %v637_v3 = vsel %vm171_vm14, 1.0, %v884_v16  ;;  %v638_v4 = vsel %vm172_vm15, 1.0, %v884_v16 }
  0xae   :  { %v194_v5 = vadd.f32 %v636_v63, %v156_v59  ;;  %v196_v6 = vadd.f32 %v638_v4, %v158_v60  ;;  %vm207_vm0 = vcmp.eq.s32.totalorder %v202_v61, %v950_v10  ;;  %vm208_vm1 = vcmp.eq.s32.totalorder %v202_v61, %v953_v11  ;;  %v493_v59 = vld [vmem:[#allocation5 + $0x30] sm:$0xff]  ;;  %v492_v60 = vld [vmem:[#allocation5 + $0x28] sm:$0xff] }
  0xaf   :  { %v189_v7 = vadd.f32 %v631_v53, %v151_v50  ;;  %vm209_vm2 = vcmp.eq.s32.totalorder %v202_v61, %v956_v12  ;;  %vm210_vm3 = vcmp.eq.s32.totalorder %v202_v61, %v959_v13  ;;  %v644_v9 = vsel %vm208_vm1, 1.0, %v884_v16  ;;  %v501_v53 = vld [vmem:[#allocation5 + $0x70] sm:$0xff]  ;;  %v491_v61 = vld [vmem:[#allocation5 + $0x20] sm:$0xff] }
  0xb0   :  { %v191_v14 = vadd.f32 %v633_v1, %v153_v51  ;;  %v193_v15 = vadd.f32 %v635_v2, %v155_v58  ;;  %v195_v17 = vadd.f32 %v637_v3, %v157_v62  ;;  %v646_v19 = vsel %vm210_vm3, 1.0, %v884_v16  ;;  %v495_v58 = vld [vmem:[#allocation5 + $0x40] sm:$0xff]  ;;  %v490_v62 = vld [vmem:[#allocation5 + $0x18] sm:$0xff]  ;;  %v489_v63 = vld [vmem:[#allocation5 + $0x10] sm:$0xff] }
  0xb1   :  { %v643_v20 = vsel %vm207_vm0, 1.0, %v884_v16  ;;  %v645_v21 = vsel %vm209_vm2, 1.0, %v884_v16  ;;  %vm203_vm4 = vcmp.eq.s32.totalorder %v199_v0, %v950_v10  ;;  %vm205_vm6 = vcmp.eq.s32.totalorder %v199_v0, %v956_v12  ;;  %v487_v1 = vld [vmem:[#allocation5] sm:$0xff] }
  0xb2   :  { %v237_v23 = vpop.permute.xlu1 %236  ;;  %v232_v24 = vadd.f32 %v644_v9, %v194_v5  ;;  %v234_v25 = vadd.f32 %v646_v19, %v196_v6  ;;  %v639_v26 = vsel %vm203_vm4, 1.0, %v884_v16  ;;  %v641_v27 = vsel %vm205_vm6, 1.0, %v884_v16 }
  0xb3   :  { %v152_v28 = vadd.f32 %v971_v18, %v114_v43  ;;  %v632_v29 = vsel %vm166_vm5, 1.0, %v884_v16  ;;  %vm204_vm7 = vcmp.eq.s32.totalorder %v199_v0, %v953_v11  ;;  %vm242_vm8 = vcmp.eq.s32.totalorder %v237_v23, %v953_v11 }
  0xb4   :  { %vm241_vm9 = vcmp.eq.s32.totalorder %v237_v23, %v950_v10  ;;  %vm243_vm10 = vcmp.eq.s32.totalorder %v237_v23, %v956_v12  ;;  %v640_v30 = vsel %vm204_vm7, 1.0, %v884_v16  ;;  %v154_v31 = vadd.f32 %v975_v22, %v1013_v44 }
  0xb5   :  { %v190_v18 = vadd.f32 %v632_v29, %v152_v28  ;;  %v648_v33 = vsel %vm242_vm8, 1.0, %v884_v16  ;;  %v634_v34 = vsel %vm168_vm11, 1.0, %v884_v16  ;;  %vm206_vm5 = vcmp.eq.s32.totalorder %v199_v0, %v959_v13  ;;  %v488_v0 = vld [vmem:[#allocation5 + $0x8] sm:$0xff] }
  0xb6   :  { %v240_v32 = vpop.permute.xlu1 %239  ;;  %vm244_vm15 = vcmp.eq.s32.totalorder %v237_v23, %v959_v13  ;;  %v227_v37 = vadd.f32 %v639_v26, %v189_v7  ;;  %v192_v39 = vadd.f32 %v634_v34, %v154_v31  ;;  %v642_v40 = vsel %vm206_vm5, 1.0, %v884_v16 }
  0xb7   :  { %vm245_vm12 = vcmp.eq.s32.totalorder %v240_v32, %v950_v10  ;;  %vm246_vm13 = vcmp.eq.s32.totalorder %v240_v32, %v953_v11  ;;  %vm248_vm14 = vcmp.eq.s32.totalorder %v240_v32, %v959_v13  ;;  %vm247_vm0 = vcmp.eq.s32.totalorder %v240_v32, %v956_v12  ;;  %v499_v12 = vld [vmem:[#allocation5 + $0x60] sm:$0xff] }
  0xb8   :  { %v651_v22 = vsel %vm245_vm12, 1.0, %v884_v16  ;;  %v652_v36 = vsel %vm246_vm13, 1.0, %v884_v16  ;;  %v654_v35 = vsel %vm248_vm14, 1.0, %v884_v16  ;;  %v228_v38 = vadd.f32 %v640_v30, %v190_v18 }
  0xb9   :  { %v650_v41 = vsel %vm244_vm15, 1.0, %v884_v16  ;;  %v647_v11 = vsel %vm241_vm9, 1.0, %v884_v16  ;;  %v229_v13 = vadd.f32 %v641_v27, %v191_v14  ;;  %v649_v42 = vsel %vm243_vm10, 1.0, %v884_v16 }
  0xba   :  { %v266_v43 = vadd.f32 %v648_v33, %v228_v38  ;;  %v230_v44 = vadd.f32 %v642_v40, %v192_v39  ;;  %v265_v45 = vadd.f32 %v647_v11, %v227_v37  ;;  %v270_v46 = vadd.f32 %v652_v36, %v232_v24  ;;  %v655_v24 = vld [vmem:[%s1106_s3] ss:$0 sm:$0xff] }
  0xbb   :  { %v231_v47 = vadd.f32 %v643_v20, %v193_v15  ;;  %v267_v48 = vadd.f32 %v649_v42, %v229_v13  ;;  %v653_v49 = vsel %vm247_vm0, 1.0, %v884_v16  ;;  %v272_v51 = vadd.f32 %v654_v35, %v234_v25  ;;  %v498_v16 = vld [vmem:[#allocation5 + $0x58] sm:$0xff] }
  0xbc   :  { %401 = vmatprep.mubr.f32.mxu0 %v266_v43  ;;  %v268_v50 = vadd.f32 %v650_v41, %v230_v44  ;;  %v233_v10 = vadd.f32 %v645_v21, %v195_v17 }
  0xbd   :  { %402 = vmatmul.mubr.f32.vlgmr.msra.gmra.mxu0 %v265_v45  ;;  %v269_v52 = vadd.f32 %v651_v22, %v231_v47 }
  0xbe   :  { %476 = vmatprep.mubr.f32.mxu1 %v268_v50  ;;  %406 = vmatprep.mubr.f32.mxu0 %v270_v46  ;;  %v271_v54 = vadd.f32 %v653_v49, %v233_v10 }
  0xbf   :  { %477 = vmatmul.mubr.f32.vlgmr.msra.gmra.mxu1 %v267_v48  ;;  %751 = vmatpush3.msra.mxu0 %v946_v8  ;;  %v494_v8 = vld [vmem:[#allocation5 + $0x38] sm:$0xff] }
  0xc0   :  { %481 = vmatprep.mubr.f32.mxu1 %v272_v51  ;;  %752 = vmatprep.subr.mxu0 %v501_v53 }
  0xc1   :  { %407 = vmatmul.mubr.f32.gmra.mxu0 %v269_v52 }
  0xc2   :  { %753 = vmatpush3.msra.mxu0 %v501_v53 }
  0xc3   :  { %482 = vmatmul.mubr.f32.gmra.mxu1 %v271_v54  ;;  %754 = vmatprep.subr.mxu0 %v500_v55 }
  0xc4   :  { %755 = vmatpush3.msra.mxu0 %v500_v55 }
  0xc5   :  { %756 = vmatprep.subr.mxu0 %v499_v12 }
  0xc6   :  { %757 = vmatpush3.msra.mxu0 %v499_v12 }
  0xc7   :  { %758 = vmatprep.subr.mxu0 %v498_v16 }
  0xc8   :  { %759 = vmatpush3.msra.mxu0 %v498_v16 }
  0xc9   :  { %760 = vmatprep.subr.mxu0 %v497_v56 }
  0xca   :  { %761 = vmatpush3.msra.mxu0 %v497_v56 }
  0xcb   :  { %762 = vmatprep.subr.mxu0 %v496_v57 }
  0xcc   :  { %763 = vmatpush3.msra.mxu0 %v496_v57 }
  0xcd   :  { %764 = vmatprep.subr.mxu0 %v495_v58 }
  0xce   :  { %765 = vmatpush3.msra.mxu0 %v495_v58 }
  0xcf   :  { %766 = vmatprep.subr.mxu0 %v494_v8 }
  0xd0   :  { %767 = vmatpush3.msra.mxu0 %v494_v8 }
  0xd1   :  { %768 = vmatprep.subr.mxu0 %v493_v59 }
  0xd2   :  { %769 = vmatpush3.msra.mxu0 %v493_v59 }
  0xd3   :  { %770 = vmatprep.subr.mxu0 %v492_v60 }
  0xd4   :  { %771 = vmatpush3.msra.mxu0 %v492_v60 }
  0xd5   :  { %772 = vmatprep.subr.mxu0 %v491_v61 }
  0xd6   :  { %773 = vmatpush3.msra.mxu0 %v491_v61 }
  0xd7   :  { %774 = vmatprep.subr.mxu0 %v490_v62 }
  0xd8   :  { %775 = vmatpush3.msra.mxu0 %v490_v62 }
  0xd9   :  { %776 = vmatprep.subr.mxu0 %v489_v63 }
  0xda   :  { %777 = vmatpush3.msra.mxu0 %v489_v63 }
  0xdb   :  { %778 = vmatprep.subr.mxu0 %v488_v0 }
  0xdc   :  { %779 = vmatpush3.msra.mxu0 %v488_v0 }
  0xdd   :  { %780 = vmatprep.subr.mxu0 %v487_v1 }
  0xde   :  { %781 = vmatpush3.msra.mxu0 %v487_v1 }
 0x17d   :  { %v688_v2 = vpop.f32.mrf.mxu0 }
 0x17f   :  { %v726_v3 = vpop.f32.mrf.mxu1  ;;  %v689_v4 = vpop.f32.mrf.mxu0 }
 0x180   :  { %v690_v5 = vadd.f32 %v689_v4, %v688_v2 }
 0x181   :  { %v727_v6 = vpop.f32.mrf.mxu1  ;;  %v691_v7 = vpop.f32.mrf.mxu0 }
 0x182   :  { %v728_v9 = vadd.f32 %v727_v6, %v726_v3 }
 0x183   :  { %v729_v14 = vpop.f32.mrf.mxu1  ;;  %v692_v15 = vpop.f32.mrf.mxu0 }
 0x184   :  { %v479_v17 = vadd.f32 %v728_v9, %v690_v5  ;;  %v693_v19 = vadd.f32 %v692_v15, %v691_v7 }
 0x185   :  { %v730_v20 = vpop.f32.mrf.mxu1 }
 0x186   :  { %v731_v21 = vadd.f32 %v730_v20, %v729_v14  ;;  %782 = vmatprep.mubr.f32.mxu0 %v479_v17 }
 0x188   :  { %v484_v23 = vadd.f32 %v731_v21, %v693_v19 }
 0x18a   :  { %783 = vmatmul.mubr.f32.vlgmr.msra.gmra.mxu0 %v484_v23 }
 0x24a   :  { %v784_v25 = vpop.f32.mrf.mxu0 }
 0x24b   :  { %v582_v26 = vadd.f32 %v784_v25, %v655_v24 }
 0x24c   :  { %v576_v27 = vpop.f32.mrf.mxu0 }
 0x24d   :  { %v586_v28 = vmax.f32 %v582_v26, 0.0  ;;  %v577_v29 = vadd.f32 %v655_v24, %v576_v27 }
 0x24f   :  { %588 = vst [vmem:[#allocation7 + $0x8] sm:$0xff] %v586_v28  ;;  %v585_v30 = vmax.f32 %v577_v29, 0.0 }
 0x251   :  { %587 = vst [vmem:[#allocation7] sm:$0xff] %v585_v30 }
 0x252   :  { %859 = shalt.err (!%p856_p0)
}
 0x253   :  { %600 = dma.vmem_to_hbm [thread:$0]  %s595_s5, 256, %s1107_s4, [#allocation4], %s875_s18, %s875_s18, %s876_s19  }
 0x254   :  { %872 = dma.done.wait [#allocation4], 256  }
 0x255   :  { %873 = vsyncadd [#allocation4], 4294967040 }
 0x256   :  { %604 = vsyncpa [#allocation3], 1 }
 0x257   :  { %605 = vsyncpa [#allocation6], 1 }
 0x258   :  { %606 = vsyncpa [#allocation4], 1 }

</bundles_post_ra>
